<compile_context>
chip_gen: v5e
topology: v5e:2x2
jax: 0.10.0
libtpu: 0.0.40
codegen_flags: <defaults>
</compile_context>

<pallas_src>
import jax
import jax.numpy as jnp
from jax.experimental import pallas as pl
from jax.experimental.pallas import tpu as pltpu


_TINY_ELEMS = 256 * 1024  # ~1 MiB of f32: below this a single grid step is fine.


def _vmem_capacity_bytes():
    """Physical VMEM per TensorCore; conservative fallback if the query fails."""
    try:
        info = pltpu.get_tpu_info()
        cap = getattr(info, "vmem_capacity_bytes", None)
        if cap:
            return int(cap)
    except Exception:
        pass
    return 64 * 1024 * 1024  # v7x per-core VMEM: smallest of v5e/v6e/v7x.


def _budgets():
    """Per-generation (vmem_limit_bytes, per-block f32-element budget)."""
    cap = _vmem_capacity_bytes()
    # ~3/4 of physical VMEM for the pipeline: ~96 MiB on v5e/v6e (128 MiB VMEM),
    # ~48 MiB on v7x (64 MiB per TensorCore).
    vmem_limit = min((cap * 3) // 4, 112 * 1024 * 1024)
    # Fused-path VMEM per grid step ~= 2x in-block + 2x out-block + ~2 slabs of
    # headroom for the f32 cast / spatial-reduce temporaries => budget /6.
    block_bytes = vmem_limit // 6
    return vmem_limit, block_bytes // 4


def _assa_fused_kernel(x_ref, w1_ref, b1_ref, w2_ref, b2_ref, ws_ref, bs_ref,
                       out_ref):
    """Whole (BB, C, HW) slab resident; everything on VPU/XLU (no MXU)."""
    x = x_ref[...].astype(jnp.float32)                        # (BB, C, HW)

    # ---- channel attention -------------------------------------------------
    # AdaptiveAvgPool2d(1): lane reduction over HW.
    pooled = jnp.mean(x, axis=2, keepdims=True)               # (BB, C, 1)
    # Conv2d(C, Cr, 1) + ReLU as VPU mul + sublane reduce over C.
    h = jnp.sum(pooled * w1_ref[...], axis=1, keepdims=True) + b1_ref[...]   # (BB, 1, Cr)
    h = jnp.maximum(h, 0.0)
    # Conv2d(Cr, C, 1) + Sigmoid as VPU mul + lane reduce over Cr.
    ca = jax.nn.sigmoid(
        jnp.sum(h * w2_ref[...], axis=2, keepdims=True) + b2_ref[...])       # (BB, C, 1)

    # ---- spatial attention -------------------------------------------------
    # Conv2d(C, 1, 1) + Sigmoid as VPU mul + sublane reduce over C.
    sa = jax.nn.sigmoid(
        jnp.sum(x * ws_ref[...], axis=1, keepdims=True) + bs_ref[0])         # (BB, 1, HW)

    # ---- combine -----------------------------------------------------------
    out_ref[...] = (x * ca * sa).astype(out_ref.dtype)


def _assa_stream_kernel(x_ref, ca_ref, ws_ref, bs_ref, out_ref):
    """Streaming elementwise pass over lane-dense HW tiles; ca precomputed."""
    x = x_ref[...].astype(jnp.float32)                         # (1, C, THW)
    sa = jax.nn.sigmoid(
        jnp.sum(x * ws_ref[...], axis=1, keepdims=True) + bs_ref[0])         # (1, 1, THW)
    out_ref[...] = (x * ca_ref[...] * sa).astype(out_ref.dtype)


def _pick_hw_tile(hw, c, max_block_elems):
    """Largest lane-dense (multiple-of-128) HW tile within the block budget."""
    max_thw = max(128, (max_block_elems // max(c, 1)) // 128 * 128)
    return hw if hw <= max_thw else max_thw


def _pick_bb(batch, slab_elems, total_elems, max_block_elems):
    """Batch rows per fused block (0 => slab too big, use streaming fallback)."""
    if slab_elems > max_block_elems:
        return 0
    cap_bb = max(1, max_block_elems // slab_elems)
    # Keep at least a few grid steps so the in/out DMA pipeline stays busy and
    # multi-TensorCore parts (v7x) can shard the "parallel" axis, unless the
    # whole problem is tiny (<~1 MiB) where per-step overhead would dominate.
    desired_steps = 1 if total_elems <= _TINY_ELEMS else min(batch, 4)
    bb_max = min(cap_bb, max(1, batch // desired_steps))
    bb = 1
    for d in range(2, bb_max + 1):
        if batch % d == 0:
            bb = d
    return bb


def assa_forward(x_nchw, w1, b1, w2, b2, ws, bs, *, max_block_elems=None):
    """ASSA forward. x_nchw: (B, C, H, W) f32/bf16 -> (B, C, H, W) same dtype.

    Weight layouts (1x1 convs squeezed), all float32:
      w1: (C, Cr)  reduce conv, input-major      b1: (Cr,)
      w2: (C, Cr)  expand conv, PyTorch (out,in) b2: (C,)
      ws: (C, 1)   spatial conv, input-major     bs: (1,)
    """
    B, C, H, W = x_nchw.shape
    HW = H * W
    Cr = w1.shape[1]
    out_dtype = x_nchw.dtype

    vmem_limit, default_block_elems = _budgets()
    if max_block_elems is None:
        max_block_elems = default_block_elems

    # Channels-first, lane-dense layout: pure reshape, no transpose, no extra
    # HBM traffic in the wrapper.
    x3 = x_nchw.reshape(B, C, HW)
    b1r = b1.reshape(1, Cr)
    b2c = b2.reshape(C, 1)
    bs1 = bs.reshape(1)

    def cparams(sem, limit=vmem_limit):
        return pltpu.CompilerParams(dimension_semantics=sem,
                                    vmem_limit_bytes=int(limit))

    slab = C * HW
    total = slab * B
    bb = _pick_bb(B, slab, total, max_block_elems)

    if bb > 0:
        out3 = pl.pallas_call(
            _assa_fused_kernel,
            out_shape=jax.ShapeDtypeStruct((B, C, HW), out_dtype),
            grid_spec=pltpu.PrefetchScalarGridSpec(
                num_scalar_prefetch=0,
                grid=(B // bb,),
                in_specs=[
                    pl.BlockSpec((bb, C, HW), lambda i: (i, 0, 0)),      # x
                    pl.BlockSpec((C, Cr), lambda i: (0, 0)),             # w1
                    pl.BlockSpec((1, Cr), lambda i: (0, 0)),             # b1
                    pl.BlockSpec((C, Cr), lambda i: (0, 0)),             # w2
                    pl.BlockSpec((C, 1), lambda i: (0, 0)),              # b2
                    pl.BlockSpec((C, 1), lambda i: (0, 0)),              # ws
                    pl.BlockSpec(memory_space=pltpu.MemorySpace.SMEM),   # bs
                ],
                out_specs=pl.BlockSpec((bb, C, HW), lambda i: (i, 0, 0)),
            ),
            compiler_params=cparams(("parallel",)),
        )(x3, w1, b1r, w2, b2c, ws, bs1)
    else:
        # Channel attention is O(B*C) work; compute it once here (one extra
        # read pass of x) so the kernel is a pure lane-dense streaming pass.
        pooled = jnp.mean(x3, axis=2, dtype=jnp.float32)               # (B, C)
        hmid = jnp.maximum(pooled @ w1 + b1, 0.0)                      # (B, Cr)
        ca = jax.nn.sigmoid(hmid @ w2.T + b2).reshape(B, C, 1)         # (B, C, 1)

        thw = _pick_hw_tile(HW, C, max_block_elems)
        # Guard for channel-heavy layers (important on v7x's 64 MiB VMEM): the
        # double-buffered in+out tiles must fit the limit; raise it if needed.
        tile_bytes = C * thw * 4
        needed = 4 * tile_bytes + (2 << 20)
        stream_limit = vmem_limit
        if needed > stream_limit:
            stream_limit = min(needed, _vmem_capacity_bytes() - (4 << 20))

        grid_t = pl.cdiv(HW, thw)
        out3 = pl.pallas_call(
            _assa_stream_kernel,
            out_shape=jax.ShapeDtypeStruct((B, C, HW), out_dtype),
            grid_spec=pltpu.PrefetchScalarGridSpec(
                num_scalar_prefetch=0,
                grid=(B, grid_t),
                in_specs=[
                    pl.BlockSpec((1, C, thw), lambda b, t: (b, 0, t)),   # x
                    pl.BlockSpec((1, C, 1), lambda b, t: (b, 0, 0)),     # ca
                    pl.BlockSpec((C, 1), lambda b, t: (0, 0)),           # ws
                    pl.BlockSpec(memory_space=pltpu.MemorySpace.SMEM),   # bs
                ],
                out_specs=pl.BlockSpec((1, C, thw), lambda b, t: (b, 0, t)),
            ),
            compiler_params=cparams(("parallel", "parallel"), stream_limit),
        )(x3, ca, ws, bs1)

    return out3.reshape(B, C, H, W)


def assa_reference(x_nchw, w1, b1, w2, b2, ws, bs):
    """Pure-JAX reference mirroring the PyTorch forward (for verification)."""
    xf = x_nchw.astype(jnp.float32)
    pooled = jnp.mean(xf, axis=(2, 3))                         # (B, C)
    h = jnp.maximum(pooled @ w1 + b1, 0.0)                     # (B, Cr)
    ca = jax.nn.sigmoid(h @ w2.T + b2)[:, :, None, None]       # (B, C, 1, 1)
    sa_logit = jnp.einsum("bchw,co->bohw", xf, ws) + bs[0]
    sa = jax.nn.sigmoid(sa_logit)                              # (B, 1, H, W)
    return xf * ca * sa


if __name__ == "__main__":
    B, C, H, W = 2, 32, 16, 16
    reduction_ratio = 16
    Cr = C // reduction_ratio  # 2

    key = jax.random.PRNGKey(0)
    kx, k1, k2, k3, k4, k5, k6 = jax.random.split(key, 7)

    x = jax.random.normal(kx, (B, C, H, W), dtype=jnp.float32)
    w1 = jax.random.normal(k1, (C, Cr), dtype=jnp.float32) * 0.1   # reduce conv
    b1 = jax.random.normal(k2, (Cr,), dtype=jnp.float32) * 0.1
    w2 = jax.random.normal(k3, (C, Cr), dtype=jnp.float32) * 0.1   # expand conv
    b2 = jax.random.normal(k4, (C,), dtype=jnp.float32) * 0.1
    ws = jax.random.normal(k5, (C, 1), dtype=jnp.float32) * 0.1    # spatial conv
    bs = jax.random.normal(k6, (1,), dtype=jnp.float32) * 0.1

    ref = assa_reference(x, w1, b1, w2, b2, ws, bs)

    # 1) Default path: tiny problem -> fused, whole batch in one grid step.
    out_fused = jax.block_until_ready(assa_forward(x, w1, b1, w2, b2, ws, bs))
    assert out_fused.shape == (B, C, H, W)
    assert jnp.allclose(out_fused, ref, atol=1e-5, rtol=1e-5), "fused path mismatch"

    # 2) Fused path with multiple pipelined grid steps (per-batch slabs).
    out_multi = jax.block_until_ready(
        assa_forward(x, w1, b1, w2, b2, ws, bs, max_block_elems=C * H * W))
    assert jnp.allclose(out_multi, ref, atol=1e-5, rtol=1e-5), "multi-step fused mismatch"

    # 3) Streaming fallback (HW tiling + channel attention hoisted to wrapper).
    out_stream = jax.block_until_ready(
        assa_forward(x, w1, b1, w2, b2, ws, bs, max_block_elems=1024))
    assert jnp.allclose(out_stream, ref, atol=1e-5, rtol=1e-5), "stream path mismatch"

    # 4) Streaming fallback with ragged HW (14x14 -> HW=196, partial last tile).
    x14 = jax.random.normal(jax.random.split(kx)[0], (B, C, 14, 14),
                            dtype=jnp.float32)
    ref14 = assa_reference(x14, w1, b1, w2, b2, ws, bs)
    out14 = jax.block_until_ready(
        assa_forward(x14, w1, b1, w2, b2, ws, bs, max_block_elems=4096))
    assert jnp.allclose(out14, ref14, atol=1e-5, rtol=1e-5), "ragged stream mismatch"

    # 5) bf16 I/O (halves HBM bytes); compute stays f32 inside the kernel.
    out_bf16 = jax.block_until_ready(
        assa_forward(x.astype(jnp.bfloat16), w1, b1, w2, b2, ws, bs))
    assert out_bf16.dtype == jnp.bfloat16
    assert jnp.allclose(out_bf16.astype(jnp.float32), ref, atol=5e-2, rtol=5e-2), \
        "bf16 path mismatch"

    print("KERNEL_OK")
</pallas_src>

<mosaic_0001>
module attributes {stable_mosaic.version = 11 : i64} {
  func.func @_assa_fused_kernel(%arg0: i32, %arg1: memref<2x32x256xf32, #tpu.memory_space<vmem>>, %arg2: memref<32x2xf32, #tpu.memory_space<vmem>>, %arg3: memref<1x2xf32, #tpu.memory_space<vmem>>, %arg4: memref<32x2xf32, #tpu.memory_space<vmem>>, %arg5: memref<32x1xf32, #tpu.memory_space<vmem>>, %arg6: memref<32x1xf32, #tpu.memory_space<vmem>>, %arg7: memref<1xf32, #tpu.memory_space<smem>>, %arg8: memref<2x32x256xf32, #tpu.memory_space<vmem>>) attributes {dimension_semantics = [#tpu.dimension_semantics<parallel>], iteration_bounds = array<i64: 1>, scalar_prefetch = 0 : i64, scratch_operands = 0 : i64, tpu.core_type = #tpu.core_type<tc>, window_params = [{transform_indices = @transform_0, window_bounds = array<i64: 2, 32, 256>}, {pipeline_mode = #tpu.pipeline_mode<synchronous>, transform_indices = @transform_1, window_bounds = array<i64: 32, 2>}, {pipeline_mode = #tpu.pipeline_mode<synchronous>, transform_indices = @transform_2, window_bounds = array<i64: 1, 2>}, {pipeline_mode = #tpu.pipeline_mode<synchronous>, transform_indices = @transform_3, window_bounds = array<i64: 32, 2>}, {pipeline_mode = #tpu.pipeline_mode<synchronous>, transform_indices = @transform_4, window_bounds = array<i64: 32, 1>}, {pipeline_mode = #tpu.pipeline_mode<synchronous>, transform_indices = @transform_5, window_bounds = array<i64: 32, 1>}, {transform_indices = @transform_6, window_bounds = array<i64: 1>}, {transform_indices = @transform_7, window_bounds = array<i64: 2, 32, 256>}]} {
    %c0 = arith.constant 0 : index
    %c0_0 = arith.constant 0 : index
    %c0_1 = arith.constant 0 : index
    %0 = vector.load %arg1[%c0, %c0_0, %c0_1] : memref<2x32x256xf32, #tpu.memory_space<vmem>>, vector<2x32x256xf32>
    %cst = arith.constant dense<0.000000e+00> : vector<2x32xf32>
    %1 = vector.multi_reduction <add>, %0, %cst [2] : vector<2x32x256xf32> to vector<2x32xf32>
    %2 = vector.shape_cast %1 : vector<2x32xf32> to vector<2x32x1xf32>
    %cst_2 = arith.constant 2.560000e+02 : f32
    %3 = vector.broadcast %cst_2 : f32 to vector<2x32x1xf32>
    %4 = arith.divf %2, %3 : vector<2x32x1xf32>
    %c0_3 = arith.constant 0 : index
    %c0_4 = arith.constant 0 : index
    %5 = vector.load %arg2[%c0_3, %c0_4] : memref<32x2xf32, #tpu.memory_space<vmem>>, vector<32x2xf32>
    %6 = vector.shape_cast %5 : vector<32x2xf32> to vector<1x32x2xf32>
    %7 = vector.broadcast %4 : vector<2x32x1xf32> to vector<2x32x2xf32>
    %8 = vector.broadcast %6 : vector<1x32x2xf32> to vector<2x32x2xf32>
    %9 = arith.mulf %7, %8 : vector<2x32x2xf32>
    %cst_5 = arith.constant dense<0.000000e+00> : vector<2x2xf32>
    %10 = vector.multi_reduction <add>, %9, %cst_5 [1] : vector<2x32x2xf32> to vector<2x2xf32>
    %11 = vector.shape_cast %10 : vector<2x2xf32> to vector<2x1x2xf32>
    %c0_6 = arith.constant 0 : index
    %c0_7 = arith.constant 0 : index
    %12 = vector.load %arg3[%c0_6, %c0_7] : memref<1x2xf32, #tpu.memory_space<vmem>>, vector<1x2xf32>
    %13 = vector.shape_cast %12 : vector<1x2xf32> to vector<1x1x2xf32>
    %14 = vector.broadcast %13 : vector<1x1x2xf32> to vector<2x1x2xf32>
    %15 = arith.addf %11, %14 : vector<2x1x2xf32>
    %cst_8 = arith.constant 0.000000e+00 : f32
    %16 = vector.broadcast %cst_8 : f32 to vector<2x1x2xf32>
    %17 = arith.maximumf %15, %16 : vector<2x1x2xf32>
    %c0_9 = arith.constant 0 : index
    %c0_10 = arith.constant 0 : index
    %18 = vector.load %arg4[%c0_9, %c0_10] : memref<32x2xf32, #tpu.memory_space<vmem>>, vector<32x2xf32>
    %19 = vector.shape_cast %18 : vector<32x2xf32> to vector<1x32x2xf32>
    %20 = vector.broadcast %17 : vector<2x1x2xf32> to vector<2x32x2xf32>
    %21 = vector.broadcast %19 : vector<1x32x2xf32> to vector<2x32x2xf32>
    %22 = arith.mulf %20, %21 : vector<2x32x2xf32>
    %cst_11 = arith.constant dense<0.000000e+00> : vector<2x32xf32>
    %23 = vector.multi_reduction <add>, %22, %cst_11 [2] : vector<2x32x2xf32> to vector<2x32xf32>
    %24 = vector.shape_cast %23 : vector<2x32xf32> to vector<2x32x1xf32>
    %c0_12 = arith.constant 0 : index
    %c0_13 = arith.constant 0 : index
    %25 = vector.load %arg5[%c0_12, %c0_13] : memref<32x1xf32, #tpu.memory_space<vmem>>, vector<32x1xf32>
    %26 = vector.shape_cast %25 : vector<32x1xf32> to vector<1x32x1xf32>
    %27 = vector.broadcast %26 : vector<1x32x1xf32> to vector<2x32x1xf32>
    %28 = arith.addf %24, %27 : vector<2x32x1xf32>
    %29 = arith.negf %28 : vector<2x32x1xf32>
    %30 = math.exp %29 : vector<2x32x1xf32>
    %cst_14 = arith.constant 1.000000e+00 : f32
    %31 = vector.broadcast %cst_14 : f32 to vector<2x32x1xf32>
    %32 = arith.addf %31, %30 : vector<2x32x1xf32>
    %33 = arith.divf %31, %32 : vector<2x32x1xf32>
    %c0_15 = arith.constant 0 : index
    %c0_16 = arith.constant 0 : index
    %34 = vector.load %arg6[%c0_15, %c0_16] : memref<32x1xf32, #tpu.memory_space<vmem>>, vector<32x1xf32>
    %35 = vector.shape_cast %34 : vector<32x1xf32> to vector<1x32x1xf32>
    %36 = vector.broadcast %35 : vector<1x32x1xf32> to vector<2x32x256xf32>
    %37 = arith.mulf %0, %36 : vector<2x32x256xf32>
    %cst_17 = arith.constant dense<0.000000e+00> : vector<2x256xf32>
    %38 = vector.multi_reduction <add>, %37, %cst_17 [1] : vector<2x32x256xf32> to vector<2x256xf32>
    %39 = vector.shape_cast %38 : vector<2x256xf32> to vector<2x1x256xf32>
    %c0_18 = arith.constant 0 : index
    %40 = memref.load %arg7[%c0_18] : memref<1xf32, #tpu.memory_space<smem>>
    %41 = vector.broadcast %40 : f32 to vector<2x1x256xf32>
    %42 = arith.addf %39, %41 : vector<2x1x256xf32>
    %43 = arith.negf %42 : vector<2x1x256xf32>
    %44 = math.exp %43 : vector<2x1x256xf32>
    %cst_19 = arith.constant 1.000000e+00 : f32
    %45 = vector.broadcast %cst_19 : f32 to vector<2x1x256xf32>
    %46 = arith.addf %45, %44 : vector<2x1x256xf32>
    %47 = arith.divf %45, %46 : vector<2x1x256xf32>
    %48 = vector.broadcast %33 : vector<2x32x1xf32> to vector<2x32x256xf32>
    %49 = arith.mulf %0, %48 : vector<2x32x256xf32>
    %50 = vector.broadcast %47 : vector<2x1x256xf32> to vector<2x32x256xf32>
    %51 = arith.mulf %49, %50 : vector<2x32x256xf32>
    %c0_20 = arith.constant 0 : index
    %c0_21 = arith.constant 0 : index
    %c0_22 = arith.constant 0 : index
    %52 = vector.load %arg8[%c0_20, %c0_21, %c0_22] : memref<2x32x256xf32, #tpu.memory_space<vmem>>, vector<2x32x256xf32>
    tpu.vector_store %arg8[%c0_20, %c0_21, %c0_22], %51 {strides = array<i32>} : memref<2x32x256xf32, #tpu.memory_space<vmem>>, vector<2x32x256xf32>,
    return
  }
  func.func @transform_0(%arg0: i32) -> (i32, i32, i32) {
    %c0_i32 = arith.constant 0 : i32
    %c0_i32_0 = arith.constant 0 : i32
    %c0_i32_1 = arith.constant 0 : i32
    return %arg0, %c0_i32, %c0_i32_0 : i32, i32, i32
  }
  func.func @transform_1(%arg0: i32) -> (i32, i32) {
    %c0_i32 = arith.constant 0 : i32
    %c0_i32_0 = arith.constant 0 : i32
    %c0_i32_1 = arith.constant 0 : i32
    return %c0_i32, %c0_i32_0 : i32, i32
  }
  func.func @transform_2(%arg0: i32) -> (i32, i32) {
    %c0_i32 = arith.constant 0 : i32
    %c0_i32_0 = arith.constant 0 : i32
    %c0_i32_1 = arith.constant 0 : i32
    return %c0_i32, %c0_i32_0 : i32, i32
  }
  func.func @transform_3(%arg0: i32) -> (i32, i32) {
    %c0_i32 = arith.constant 0 : i32
    %c0_i32_0 = arith.constant 0 : i32
    %c0_i32_1 = arith.constant 0 : i32
    return %c0_i32, %c0_i32_0 : i32, i32
  }
  func.func @transform_4(%arg0: i32) -> (i32, i32) {
    %c0_i32 = arith.constant 0 : i32
    %c0_i32_0 = arith.constant 0 : i32
    %c0_i32_1 = arith.constant 0 : i32
    return %c0_i32, %c0_i32_0 : i32, i32
  }
  func.func @transform_5(%arg0: i32) -> (i32, i32) {
    %c0_i32 = arith.constant 0 : i32
    %c0_i32_0 = arith.constant 0 : i32
    %c0_i32_1 = arith.constant 0 : i32
    return %c0_i32, %c0_i32_0 : i32, i32
  }
  func.func @transform_6(%arg0: i32) -> i32 {
    %c0_i32 = arith.constant 0 : i32
    %c0_i32_0 = arith.constant 0 : i32
    return %c0_i32 : i32
  }
  func.func @transform_7(%arg0: i32) -> (i32, i32, i32) {
    %c0_i32 = arith.constant 0 : i32
    %c0_i32_0 = arith.constant 0 : i32
    %c0_i32_1 = arith.constant 0 : i32
    return %arg0, %c0_i32, %c0_i32_0 : i32, i32, i32
  }
}

</mosaic_0001>

<bundles_post_ra>
// kernel: tpu_custom_call.1
= control target key start
LH: loop header
LB: loop body
LE: loop exit
PB: predicated region body
PF: predicated region fallthrough
CT: control target
= control target key end

     0   :  { %13 = vsyncpa [#allocation4], 0  ;;  %s1035_s0 = inlined_call_operand.hbm [shape: f32[2,32,256], index: 0, kind: input, shape index: {}]   ;;  %s1036_s1 = inlined_call_operand.vmem [shape: f32[32,2], index: 1, kind: input, shape index: {}]   ;;  %s1037_s2 = inlined_call_operand.vmem [shape: f32[1,2], index: 2, kind: input, shape index: {}]   ;;  %s1038_s3 = inlined_call_operand.vmem [shape: f32[32,2], index: 3, kind: input, shape index: {}]   ;;  %s1039_s4 = inlined_call_operand.vmem [shape: f32[32,1], index: 4, kind: input, shape index: {}]   ;;  %s1040_s5 = inlined_call_operand.vmem [shape: f32[32,1], index: 5, kind: input, shape index: {}]   ;;  %s1041_s6 = inlined_call_operand.<no memory space> [shape: f32[1], index: 6, kind: input, shape index: {}]   ;;  %s1042_s7 = inlined_call_operand.hbm [shape: f32[2,32,256], index: 7, kind: output, shape index: {}]  }
   0x1   :  { %14 = vsyncpa [#allocation5], 0  ;;  %s19_s26 = sshll.u32 %s1035_s0, 4  ;;  %s733_s27 = smov [#allocation3]   ;;  %s20_s26 = int_to_ptr.hbm [resolvable:$true] %s19_s26 }
   0x2   :  { %s21_s28 = sshll.u32 %s733_s27, 4  ;;  %s734_s29 = smov 256   ;;  %s22_s28 = int_to_ptr.vmem [resolvable:$true] %s21_s28 }
   0x3   :  { %s735_s30 = smov 16  }
   0x4   :  { %27 = dma.hbm_to_vmem [thread:$0]  %s20_s26, 2048, %s22_s28, [#allocation4], %s734_s29, %s734_s29, %s735_s30  }
   0x5   :  { %729 = dma.done.wait [#allocation4], 2048  }
   0x6   :  { %730 = vsyncadd [#allocation4], 4294965248  ;;  %v785_v0 = vld [vmem:[#allocation3] sm:$0xff]  ;;  %v787_v1 = vld [vmem:[#allocation3 + $0x8] sm:$0xff]  ;;  %v736_v24 = vmov 256.0   ;;  %vm111_vm1 = vcmask 15360  }
   0x7   :  { %v789_v2 = vld [vmem:[#allocation3 + $0x40] sm:$0xff]  ;;  %v60_v3 = vadd.f32 %v787_v1, %v785_v0  ;;  %v793_v4 = vld [vmem:[#allocation3 + $0x48] sm:$0xff]  ;;  %v803_v9 = vld [vmem:[#allocation3 + $0x10] sm:$0xff]  ;;  %631 = vrcp.f32 %v736_v24  ;;  %s597_s18 = sshll.u32 %s1042_s7, 4  ;;  %s598_s18 = int_to_ptr.hbm [resolvable:$true] %s597_s18 }
   0x8   :  { %v72_v5 = vadd.f32 %v793_v4, %v789_v2  ;;  %v797_v6 = vld [vmem:[#allocation3 + $0x20] sm:$0xff]  ;;  %v799_v7 = vld [vmem:[#allocation3 + $0x28] sm:$0xff]  ;;  %v805_v10 = vld [vmem:[#allocation3 + $0x18] sm:$0xff] }
   0x9   :  { %61 = vadd.xlane.f32.xlu0 %v60_v3  ;;  %v66_v8 = vadd.f32 %v799_v7, %v797_v6  ;;  %v807_v11 = vld [vmem:[#allocation3 + $0x50] sm:$0xff]  ;;  %v809_v12 = vld [vmem:[#allocation3 + $0x58] sm:$0xff]  ;;  %v811_v13 = vld [vmem:[#allocation3 + $0x60] sm:$0xff]  ;;  %v63_v15 = vadd.f32 %v805_v10, %v803_v9 }
   0xa   :  { %73 = vadd.xlane.f32.xlu1 %v72_v5  ;;  %v813_v14 = vld [vmem:[#allocation3 + $0x68] sm:$0xff]  ;;  %v75_v16 = vadd.f32 %v809_v12, %v807_v11  ;;  %v821_v18 = vld [vmem:[#allocation3 + $0x30] sm:$0xff]  ;;  %v823_v19 = vld [vmem:[#allocation3 + $0x38] sm:$0xff] }
   0xb   :  { %67 = vadd.xlane.f32.xlu2 %v66_v8  ;;  %v78_v17 = vadd.f32 %v813_v14, %v811_v13  ;;  %v825_v20 = vld [vmem:[#allocation3 + $0x70] sm:$0xff]  ;;  %v827_v21 = vld [vmem:[#allocation3 + $0x78] sm:$0xff]  ;;  %v69_v22 = vadd.f32 %v823_v19, %v821_v18  ;;  %v99_v35 = vld [vmem:[%s1036_s1] sm:$0xff] }
   0xc   :  { %v81_v23 = vadd.f32 %v827_v21, %v825_v20  ;;  %v100_v38 = vld [vmem:[%s1036_s1 + $0x8] sm:$0xff]  ;;  %v101_v43 = vld [vmem:[%s1036_s1 + $0x10] sm:$0xff]  ;;  %v102_v58 = vld [vmem:[%s1036_s1 + $0x18] sm:$0xff] }
   0xd   :  { %v632_v25 = vpop.eup %631 }
   0xe   :  { %v85_v26 = vmul.f32 256.0, %v632_v25  ;;  %vm89_vm0 = vweird.f32 %v632_v25 }
  0x10   :  { %v86_v27 = vsub.f32 1.0, %v85_v26 }
  0x11   :  { %64 = vadd.xlane.f32.xlu0 %v63_v15 }
  0x12   :  { %76 = vadd.xlane.f32.xlu1 %v75_v16  ;;  %v87_v28 = vmul.f32 %v632_v25, %v86_v27 }
  0x13   :  { %79 = vadd.xlane.f32.xlu2 %v78_v17 }
  0x14   :  { %v88_v29 = vadd.f32 %v632_v25, %v87_v28 }
  0x16   :  { %v90_v33 = vsel %vm89_vm0, %v632_v25, %v88_v29 }
  0x19   :  { %70 = vadd.xlane.f32.xlu0 %v69_v22 }
  0x1a   :  { %82 = vadd.xlane.f32.xlu1 %v81_v23 }
  0x7c   :  { %v62_v30 = vpop.xlane.xlu0 %61 }
  0x7d   :  { %v74_v31 = vpop.xlane.xlu1 %73  ;;  %v91_v36 = vmul.f32 %v90_v33, %v62_v30 }
  0x7e   :  { %v68_v32 = vpop.xlane.xlu2 %67  ;;  %v95_v34 = vmul.f32 %v90_v33, %v74_v31 }
  0x7f   :  { %v93_v41 = vmul.f32 %v90_v33, %v68_v32  ;;  %v103_v46 = vmul.f32 %v99_v35, %v91_v36  ;;  %v737_v32 = vmov 0   ;;  %v138_v36 = vld [vmem:[%s1037_s2] sm:$0x1] }
  0x80   :  { %v107_v37 = vmul.f32 %v99_v35, %v95_v34  ;;  %629 = vset.pattern.permute.xlu2 %v737_v32  ;;  %628 = vset.pattern.permute.xlu1 %v737_v32 }
  0x81   :  { %v105_v52 = vmul.f32 %v101_v43, %v93_v41  ;;  %v112_v55 = vsel %vm111_vm1, %v103_v46, 0.0  ;;  %630 = vset.pattern.permute.xlu0 %v737_v32 }
  0x82   :  { %v125_v49 = vsel %vm111_vm1, %v107_v37, 0.0 }
  0x83   :  { %v115_v61 = vsel %vm111_vm1, %v105_v52, 0.0 }
  0x84   :  { %v65_v39 = vpop.xlane.xlu0 %64 }
  0x85   :  { %v92_v40 = vmul.f32 %v90_v33, %v65_v39  ;;  %v77_v42 = vpop.xlane.xlu1 %76 }
  0x86   :  { %v96_v44 = vmul.f32 %v90_v33, %v77_v42  ;;  %v80_v45 = vpop.xlane.xlu2 %79  ;;  %v145_v42 = vld [vmem:[%s1038_s3 + $0x10] sm:$0xff] }
  0x87   :  { %v104_v47 = vmul.f32 %v100_v38, %v92_v40  ;;  %v97_v48 = vmul.f32 %v90_v33, %v80_v45 }
  0x88   :  { %v108_v50 = vmul.f32 %v100_v38, %v96_v44  ;;  %v143_v44 = vld [vmem:[%s1038_s3] sm:$0xff] }
  0x89   :  { %v113_v51 = vsel %vm111_vm1, %v104_v47, 0.0  ;;  %v109_v53 = vmul.f32 %v101_v43, %v97_v48  ;;  %v144_v43 = vld [vmem:[%s1038_s3 + $0x8] sm:$0xff] }
  0x8a   :  { %v126_v54 = vsel %vm111_vm1, %v108_v50, 0.0  ;;  %v114_v57 = vadd.f32 %v113_v51, %v112_v55 }
  0x8b   :  { %v127_v56 = vadd.f32 %v126_v54, %v125_v49  ;;  %v128_v60 = vsel %vm111_vm1, %v109_v53, 0.0 }
  0x8c   :  { %v71_v59 = vpop.xlane.xlu0 %70  ;;  %v116_v15 = vadd.f32 %v115_v61, %v114_v57 }
  0x8d   :  { %v94_v62 = vmul.f32 %v90_v33, %v71_v59  ;;  %v83_v63 = vpop.xlane.xlu1 %82  ;;  %v129_v8 = vadd.f32 %v128_v60, %v127_v56 }
  0x8e   :  { %v98_v3 = vmul.f32 %v90_v33, %v83_v63 }
  0x8f   :  { %v106_v5 = vmul.f32 %v102_v58, %v94_v62 }
  0x90   :  { %v110_v16 = vmul.f32 %v102_v58, %v98_v3  ;;  %v146_v58 = vld [vmem:[%s1038_s3 + $0x18] sm:$0xff] }
  0x91   :  { %v117_v17 = vsel %vm111_vm1, %v106_v5, 0.0  ;;  %v346_v5 = vld [vmem:[%s1040_s5 + $0x8] sm:$0xff] }
  0x92   :  { %v118_v22 = vadd.f32 %v117_v17, %v116_v15  ;;  %v130_v23 = vsel %vm111_vm1, %v110_v16, 0.0  ;;  %v347_v15 = vld [vmem:[%s1040_s5 + $0x10] sm:$0xff]  ;;  %v348_v16 = vld [vmem:[%s1040_s5 + $0x18] sm:$0xff] }
  0x93   :  { %v131_v24 = vadd.f32 %v130_v23, %v129_v8  ;;  %v345_v8 = vld [vmem:[%s1040_s5] sm:$0xff]  ;;  %v891_v17 = vld [vmem:[%s1039_s4 + $0x10] sm:$0xff] }
  0x94   :  { %v119_v25 = vrot.slane %v118_v22, 4  ;;  %v181_v23 = vld [vmem:[%s1039_s4] sm:$0xff] }
  0x95   :  { %v132_v26 = vrot.slane %v131_v24, 4 }
  0x96   :  { %v120_v27 = vadd.f32 %v119_v25, %v118_v22  ;;  %v182_v22 = vld [vmem:[%s1039_s4 + $0x8] sm:$0xff] }
  0x97   :  { %v133_v28 = vadd.f32 %v132_v26, %v131_v24 }
  0x98   :  { %v121_v29 = vrot.slane %v120_v27, 2 }
  0x99   :  { %v134_v30 = vrot.slane %v133_v28, 2 }
  0x9a   :  { %v122_v31 = vadd.f32 %v121_v29, %v120_v27 }
  0x9b   :  { %v135_v33 = vadd.f32 %v134_v30, %v133_v28 }
  0x9c   :  { %v123_v34 = vrot.slane %v122_v31, 1 }
  0x9d   :  { %v136_v35 = vrot.slane %v135_v33, 1 }
  0x9e   :  { %v124_v37 = vadd.f32 %v123_v34, %v122_v31 }
  0x9f   :  { %v137_v38 = vadd.f32 %v136_v35, %v135_v33  ;;  %v184_v33 = vld [vmem:[%s1039_s4 + $0x18] sm:$0xff] }
  0xa0   :  { %v139_v39 = vadd.f32 %v138_v36, %v124_v37 }
  0xa1   :  { %v140_v40 = vadd.f32 %v138_v36, %v137_v38 }
  0xa2   :  { %v141_v41 = vmax.f32 %v139_v39, 0.0 }
  0xa3   :  { %v142_v45 = vmax.f32 %v140_v40, 0.0 }
  0xa4   :  { %v147_v46 = vperm.slane %v141_v41, 0 }
  0xa5   :  { %v148_v47 = vperm.slane %v142_v45, 0 }
  0xa6   :  { %v151_v48 = vmul.f32 %v147_v46, %v145_v42  ;;  %v150_v49 = vmul.f32 %v147_v46, %v144_v43  ;;  %v149_v50 = vmul.f32 %v147_v46, %v143_v44  ;;  %v152_v59 = vmul.f32 %v147_v46, %v146_v58 }
  0xa7   :  { %v155_v51 = vmul.f32 %v148_v47, %v145_v42  ;;  %v154_v56 = vmul.f32 %v148_v47, %v144_v43  ;;  %v153_v57 = vmul.f32 %v148_v47, %v143_v44  ;;  %v156_v63 = vmul.f32 %v148_v47, %v146_v58 }
  0xa8   :  { %v163_v52 = vsel %vm111_vm1, %v151_v48, 0.0  ;;  %v160_v53 = vsel %vm111_vm1, %v150_v49, 0.0  ;;  %v157_v54 = vsel %vm111_vm1, %v149_v50, 0.0  ;;  %v166_v62 = vsel %vm111_vm1, %v152_v59, 0.0 }
  0xa9   :  { %164 = vadd.xlane.f32.xlu1 %v163_v52  ;;  %161 = vadd.xlane.f32.xlu0 %v160_v53  ;;  %v175_v55 = vsel %vm111_vm1, %v155_v51, 0.0  ;;  %v172_v60 = vsel %vm111_vm1, %v154_v56, 0.0  ;;  %v169_v61 = vsel %vm111_vm1, %v153_v57, 0.0  ;;  %v178_v3 = vsel %vm111_vm1, %v156_v63, 0.0 }
  0xaa   :  { %158 = vadd.xlane.f32.xlu2 %v157_v54 }
  0xb1   :  { %173 = vadd.xlane.f32.xlu1 %v172_v60  ;;  %170 = vadd.xlane.f32.xlu0 %v169_v61 }
  0xb2   :  { %167 = vadd.xlane.f32.xlu2 %v166_v62 }
  0xb9   :  { %179 = vadd.xlane.f32.xlu0 %v178_v3 }
  0xca   :  { %356 = vperm.xlu2 %629, %v346_v5   ;;  %351 = vperm.xlu1 %628, %v345_v8  }
  0xcd   :  { %361 = vperm.xlu0 %630, %v347_v15  }
  0xf3   :  { %176 = vadd.xlane.f32.xlu2 %v175_v55 }
 0x10b   :  { %366 = vperm.xlu2 %629, %v348_v16  }
 0x11c   :  { %v165_v24 = vpop.xlane.xlu1 %164  ;;  %v162_v25 = vpop.xlane.xlu0 %161 }
 0x11d   :  { %v187_v26 = vadd.f32 %v891_v17, %v165_v24  ;;  %v186_v27 = vadd.f32 %v182_v22, %v162_v25  ;;  %v159_v28 = vpop.xlane.xlu2 %158 }
 0x11e   :  { %v185_v29 = vadd.f32 %v181_v23, %v159_v28 }
 0x11f   :  { %v612_v30 = vmul.f32 -1.442695, %v187_v26  ;;  %v611_v31 = vmul.f32 -1.442695, %v186_v27 }
 0x120   :  { %v610_v32 = vmul.f32 -1.442695, %v185_v29 }
 0x121   :  { %633 = vpow2.f32 %v612_v30 }
 0x122   :  { %635 = vpow2.f32 %v611_v31 }
 0x123   :  { %637 = vpow2.f32 %v610_v32 }
 0x124   :  { %v174_v34 = vpop.xlane.xlu1 %173  ;;  %v171_v35 = vpop.xlane.xlu0 %170 }
 0x125   :  { %v190_v36 = vadd.f32 %v182_v22, %v174_v34  ;;  %v189_v37 = vadd.f32 %v181_v23, %v171_v35  ;;  %v168_v38 = vpop.xlane.xlu2 %167 }
 0x126   :  { %v188_v39 = vadd.f32 %v184_v33, %v168_v38 }
 0x127   :  { %v634_v40 = vpop.eup %633  ;;  %v615_v41 = vmul.f32 -1.442695, %v190_v36  ;;  %v614_v46 = vmul.f32 -1.442695, %v189_v37 }
 0x128   :  { %v636_v42 = vpop.eup %635  ;;  %v903_v43 = vadd.f32 1.0, %v634_v40  ;;  %v613_v48 = vmul.f32 -1.442695, %v188_v39 }
 0x129   :  { %v638_v44 = vpop.eup %637  ;;  %v218_v45 = vadd.f32 1.0, %v636_v42  ;;  %639 = vpow2.f32 %v615_v41 }
 0x12a   :  { %641 = vrcp.f32 %v903_v43  ;;  %v217_v47 = vadd.f32 1.0, %v638_v44  ;;  %v264_v61 = vand.u32 2147483647, %v903_v43  ;;  %v266_v37 = vand.u32 2147483648, %v903_v43 }
 0x12b   :  { %643 = vrcp.f32 %v218_v45  ;;  %v249_v5 = vand.u32 2147483647, %v218_v45  ;;  %v251_v8 = vand.u32 2147483648, %v218_v45  ;;  %vm245_vm3 = vweird.f32 %v218_v45 }
 0x12c   :  { %645 = vrcp.f32 %v217_v47  ;;  %v180_v49 = vpop.xlane.xlu0 %179  ;;  %v234_v22 = vand.u32 2147483647, %v217_v47  ;;  %v236_v25 = vand.u32 2147483648, %v217_v47  ;;  %vm230_vm6 = vweird.f32 %v217_v47 }
 0x12d   :  { %647 = vpow2.f32 %v614_v46  ;;  %v192_v50 = vadd.f32 %v184_v33, %v180_v49  ;;  %vm250_vm5 = vcmp.eq.f32.partialorder %v249_v5, 8.507059e+37  ;;  %v252_v31 = vor.u32 1.1754944e-38, %v251_v8 }
 0x12e   :  { %649 = vpow2.f32 %v613_v48  ;;  %vm235_vm9 = vcmp.eq.f32.partialorder %v234_v22, 8.507059e+37  ;;  %v237_v36 = vor.u32 1.1754944e-38, %v236_v25  ;;  %vm260_vm13 = vweird.f32 %v903_v43 }
 0x12f   :  { %v640_v51 = vpop.eup %639  ;;  %v617_v52 = vmul.f32 -1.442695, %v192_v50  ;;  %vm938_vm15 = vcmp.eq.f32.partialorder %v264_v61, 8.507059e+37 }
 0x130   :  { %v906_v53 = vpop.eup %641  ;;  %v908_v54 = vadd.f32 1.0, %v640_v51 }
 0x131   :  { %v644_v55 = vpop.eup %643  ;;  %651 = vpow2.f32 %v617_v52  ;;  %v256_v56 = vmul.f32 %v906_v53, %v903_v43  ;;  %vm261_vm10 = vweird.f32 %v906_v53 }
 0x132   :  { %v646_v57 = vpop.eup %645  ;;  %653 = vrcp.f32 %v908_v54  ;;  %v241_v58 = vmul.f32 %v644_v55, %v218_v45  ;;  %vm246_vm2 = vweird.f32 %v644_v55  ;;  %v309_v44 = vand.u32 2147483647, %v908_v54  ;;  %vm934_vm14 = vmor %vm260_vm13, %vm261_vm10 }
 0x133   :  { %v648_v59 = vpop.eup %647  ;;  %v226_v60 = vmul.f32 %v646_v57, %v217_v47  ;;  %v257_v23 = vsub.f32 1.0, %v256_v56  ;;  %vm231_vm4 = vweird.f32 %v646_v57  ;;  %vm247_vm7 = vmor %vm245_vm3, %vm246_vm2  ;;  %v311_v45 = vand.u32 2147483648, %v908_v54 }
 0x134   :  { %v650_v62 = vpop.eup %649  ;;  %v914_v63 = vadd.f32 1.0, %v648_v59  ;;  %v242_v3 = vsub.f32 1.0, %v241_v58  ;;  %vm232_vm8 = vmor %vm230_vm6, %vm231_vm4  ;;  %vm305_vm11 = vweird.f32 %v908_v54  ;;  %vm946_vm1 = vcmp.eq.f32.partialorder %v309_v44, 8.507059e+37 }
 0x135   :  { %v916_v15 = vadd.f32 1.0, %v650_v62  ;;  %v227_v16 = vsub.f32 1.0, %v226_v60  ;;  %v258_v34 = vmul.f32 %v906_v53, %v257_v23  ;;  %v312_v43 = vor.u32 1.1754944e-38, %v311_v45 }
 0x136   :  { %655 = vrcp.f32 %v914_v63  ;;  %v243_v24 = vmul.f32 %v644_v55, %v242_v3  ;;  %v267_v56 = vor.u32 1.1754944e-38, %v266_v37  ;;  %vm290_vm2 = vweird.f32 %v914_v63 }
 0x137   :  { %v652_v26 = vpop.eup %651  ;;  %657 = vrcp.f32 %v916_v15  ;;  %v228_v27 = vmul.f32 %v646_v57, %v227_v16  ;;  %v259_v47 = vadd.f32 %v906_v53, %v258_v34  ;;  %vm275_vm3 = vweird.f32 %v916_v15 }
 0x138   :  { %v654_v28 = vpop.eup %653  ;;  %v920_v29 = vadd.f32 1.0, %v652_v26  ;;  %v244_v30 = vadd.f32 %v644_v55, %v243_v24  ;;  %v279_v62 = vand.u32 2147483647, %v916_v15  ;;  %v281_v3 = vand.u32 2147483648, %v916_v15 }
 0x139   :  { %v229_v32 = vadd.f32 %v646_v57, %v228_v27  ;;  %v301_v33 = vmul.f32 %v654_v28, %v908_v54  ;;  %vm306_vm12 = vweird.f32 %v654_v28  ;;  %v263_v59 = vsel %vm934_vm14, %v906_v53, %v259_v47 }
 0x13a   :  { %v248_v35 = vsel %vm247_vm7, %v644_v55, %v244_v30  ;;  %659 = vrcp.f32 %v920_v29  ;;  %vm942_vm0 = vmor %vm305_vm11, %vm306_vm12  ;;  %v268_v53 = vsel %vm938_vm15, %v267_v56, %v263_v59  ;;  %v296_v23 = vand.u32 2147483648, %v914_v63 }
 0x13b   :  { %v253_v38 = vsel %vm250_vm5, %v252_v31, %v248_v35  ;;  %v233_v39 = vsel %vm232_vm8, %v646_v57, %v229_v32  ;;  %v302_v40 = vsub.f32 1.0, %v301_v33  ;;  %v294_v27 = vand.u32 2147483647, %v914_v63 }
 0x13c   :  { %v656_v41 = vpop.eup %655  ;;  %510 = vperm.xlu2 %629, %v253_v38   ;;  %v238_v42 = vsel %vm235_vm9, %v237_v36, %v233_v39  ;;  %vm280_vm8 = vcmp.eq.f32.partialorder %v279_v62, 8.507059e+37  ;;  %v297_v33 = vor.u32 1.1754944e-38, %v296_v23  ;;  %vm335_vm10 = vweird.f32 %v920_v29 }
 0x13d   :  { %v658_v46 = vpop.eup %657  ;;  %505 = vperm.xlu1 %628, %v238_v42   ;;  %v303_v48 = vmul.f32 %v654_v28, %v302_v40  ;;  %v286_v50 = vmul.f32 %v656_v41, %v914_v63  ;;  %vm291_vm5 = vweird.f32 %v656_v41  ;;  %vm295_vm9 = vcmp.eq.f32.partialorder %v294_v27, 8.507059e+37  ;;  %v357_v42 = vpop.permute.xlu2 %356 }
 0x13e   :  { %v271_v49 = vmul.f32 %v658_v46, %v916_v15  ;;  %vm276_vm4 = vweird.f32 %v658_v46  ;;  %vm292_vm7 = vmor %vm290_vm2, %vm291_vm5  ;;  %v341_v37 = vand.u32 2147483648, %v920_v29  ;;  %v339_v63 = vand.u32 2147483647, %v920_v29 }
 0x13f   :  { %v304_v58 = vadd.f32 %v654_v28, %v303_v48  ;;  %v287_v61 = vsub.f32 1.0, %v286_v50  ;;  %vm277_vm6 = vmor %vm275_vm3, %vm276_vm4  ;;  %v371_v48 = vmul.f32 %v357_v42, %v803_v9  ;;  %v379_v50 = vmul.f32 %v357_v42, %v807_v11  ;;  %v362_v52 = vpop.permute.xlu0 %361 }
 0x140   :  { %v660_v57 = vpop.eup %659  ;;  %v272_v60 = vsub.f32 1.0, %v271_v49  ;;  %v342_v39 = vor.u32 1.1754944e-38, %v341_v37  ;;  %vm340_vm13 = vcmp.eq.f32.partialorder %v339_v63, 8.507059e+37  ;;  %v380_v51 = vmul.f32 %v357_v42, %v809_v12 }
 0x141   :  { %v308_v5 = vsel %vm942_vm0, %v654_v28, %v304_v58  ;;  %v288_v16 = vmul.f32 %v656_v41, %v287_v61  ;;  %v331_v24 = vmul.f32 %v660_v57, %v920_v29  ;;  %v282_v28 = vor.u32 1.1754944e-38, %v281_v3 }
 0x142   :  { %v273_v8 = vmul.f32 %v658_v46, %v272_v60  ;;  %v313_v22 = vsel %vm946_vm1, %v312_v43, %v308_v5  ;;  %vm336_vm11 = vweird.f32 %v660_v57  ;;  %v372_v29 = vmul.f32 %v357_v42, %v805_v10 }
 0x143   :  { %530 = vperm.xlu0 %630, %v313_v22   ;;  %v289_v26 = vadd.f32 %v656_v41, %v288_v16  ;;  %v332_v30 = vsub.f32 1.0, %v331_v24  ;;  %vm337_vm12 = vmor %vm335_vm10, %vm336_vm11  ;;  %v373_v59 = vmul.f32 %v362_v52, %v797_v6  ;;  %v374_v60 = vmul.f32 %v362_v52, %v799_v7 }
 0x144   :  { %v274_v25 = vadd.f32 %v658_v46, %v273_v8  ;;  %v381_v61 = vmul.f32 %v362_v52, %v811_v13  ;;  %v382_v62 = vmul.f32 %v362_v52, %v813_v14 }
 0x145   :  { %515 = vperm.xlu1 %628, %v268_v53   ;;  %v293_v34 = vsel %vm292_vm7, %v656_v41, %v289_v26  ;;  %v333_v35 = vmul.f32 %v660_v57, %v332_v30  ;;  %v352_v41 = vpop.permute.xlu1 %351 }
 0x146   :  { %v278_v31 = vsel %vm277_vm6, %v658_v46, %v274_v25  ;;  %v298_v36 = vsel %vm295_vm9, %v297_v33, %v293_v34  ;;  %v369_v44 = vmul.f32 %v352_v41, %v785_v0  ;;  %v370_v45 = vmul.f32 %v352_v41, %v787_v1 }
 0x147   :  { %v283_v32 = vsel %vm280_vm8, %v282_v28, %v278_v31  ;;  %v334_v15 = vadd.f32 %v660_v57, %v333_v35  ;;  %v377_v46 = vmul.f32 %v352_v41, %v789_v2  ;;  %v378_v47 = vmul.f32 %v352_v41, %v793_v4 }
 0x148   :  { %520 = vperm.xlu2 %629, %v283_v32   ;;  %v385_v55 = vadd.f32 %v371_v48, %v369_v44  ;;  %v394_v43 = vadd.f32 %v372_v29, %v370_v45  ;;  %v422_v29 = vstv %s1041_s6  ;;  %s738_s6 = smov [#allocation6]  }
 0x149   :  { %v338_v38 = vsel %vm337_vm12, %v660_v57, %v334_v15  ;;  %v403_v56 = vadd.f32 %v379_v50, %v377_v46  ;;  %v412_v57 = vadd.f32 %v380_v51, %v378_v47  ;;  %s595_s15 = sshll.u32 %s738_s6, 4  ;;  %s596_s15 = int_to_ptr.vmem [resolvable:$true] %s595_s15 }
 0x14a   :  { %v343_v40 = vsel %vm340_vm13, %v342_v39, %v338_v38  ;;  %v386_v3 = vadd.f32 %v385_v55, %v373_v59  ;;  %v395_v5 = vadd.f32 %v394_v43, %v374_v60 }
 0x14b   :  { %v404_v8 = vadd.f32 %v403_v56, %v381_v61  ;;  %v413_v16 = vadd.f32 %v412_v57, %v382_v62 }
 0x14d   :  { %525 = vperm.xlu1 %628, %v298_v36  }
 0x155   :  { %540 = vperm.xlu1 %628, %v343_v40  }
 0x166   :  { %v177_v49 = vpop.xlane.xlu2 %176 }
 0x167   :  { %v191_v54 = vadd.f32 %v891_v17, %v177_v49 }
 0x169   :  { %v616_v58 = vmul.f32 -1.442695, %v191_v54 }
 0x16b   :  { %661 = vpow2.f32 %v616_v58 }
 0x16e   :  { %v367_v22 = vpop.permute.xlu2 %366 }
 0x16f   :  { %v375_v17 = vmul.f32 %v367_v22, %v821_v18  ;;  %v376_v53 = vmul.f32 %v367_v22, %v823_v19  ;;  %v383_v23 = vmul.f32 %v367_v22, %v825_v20  ;;  %v384_v24 = vmul.f32 %v367_v22, %v827_v21 }
 0x171   :  { %v662_v25 = vpop.eup %661  ;;  %v387_v26 = vadd.f32 %v386_v3, %v375_v17  ;;  %v396_v27 = vadd.f32 %v395_v5, %v376_v53  ;;  %v405_v28 = vadd.f32 %v404_v8, %v383_v23  ;;  %v414_v30 = vadd.f32 %v413_v16, %v384_v24 }
 0x172   :  { %v223_v31 = vadd.f32 1.0, %v662_v25 }
 0x173   :  { %v388_v32 = vrot.slane %v387_v26, 4  ;;  %v397_v33 = vrot.slane %v396_v27, 4  ;;  %v406_v34 = vrot.slane %v405_v28, 4  ;;  %v415_v35 = vrot.slane %v414_v30, 4 }
 0x174   :  { %663 = vrcp.f32 %v223_v31  ;;  %v326_v58 = vand.u32 2147483648, %v223_v31  ;;  %v324_v61 = vand.u32 2147483647, %v223_v31  ;;  %vm320_vm15 = vweird.f32 %v223_v31 }
 0x175   :  { %v389_v36 = vadd.f32 %v388_v32, %v387_v26  ;;  %v398_v15 = vadd.f32 %v397_v33, %v396_v27  ;;  %v407_v37 = vadd.f32 %v406_v34, %v405_v28  ;;  %v416_v63 = vadd.f32 %v415_v35, %v414_v30 }
 0x176   :  { %v327_v16 = vor.u32 1.1754944e-38, %v326_v58  ;;  %vm325_vm1 = vcmp.eq.f32.partialorder %v324_v61, 8.507059e+37 }
 0x177   :  { %v390_v38 = vrot.slane %v389_v36, 2  ;;  %v399_v39 = vrot.slane %v398_v15, 2  ;;  %v408_v40 = vrot.slane %v407_v37, 2  ;;  %v417_v42 = vrot.slane %v416_v63, 2 }
 0x179   :  { %v391_v41 = vadd.f32 %v390_v38, %v389_v36  ;;  %v400_v44 = vadd.f32 %v399_v39, %v398_v15  ;;  %v409_v45 = vadd.f32 %v408_v40, %v407_v37  ;;  %v418_v50 = vadd.f32 %v417_v42, %v416_v63 }
 0x17a   :  { %v664_v46 = vpop.eup %663 }
 0x17b   :  { %v392_v47 = vrot.slane %v391_v41, 1  ;;  %v401_v48 = vrot.slane %v400_v44, 1  ;;  %v410_v49 = vrot.slane %v409_v45, 1  ;;  %v316_v51 = vmul.f32 %v664_v46, %v223_v31 }
 0x17c   :  { %v419_v59 = vrot.slane %v418_v50, 1  ;;  %vm321_vm14 = vweird.f32 %v664_v46 }
 0x17d   :  { %v393_v52 = vadd.f32 %v392_v47, %v391_v41  ;;  %v402_v54 = vadd.f32 %v401_v48, %v400_v44  ;;  %v317_v55 = vsub.f32 1.0, %v316_v51  ;;  %v411_v43 = vadd.f32 %v410_v49, %v409_v45  ;;  %vm322_vm0 = vmor %vm320_vm15, %vm321_vm14 }
 0x17e   :  { %v420_v22 = vadd.f32 %v419_v59, %v418_v50 }
 0x17f   :  { %v423_v56 = vadd.f32 %v422_v29, %v393_v52  ;;  %v424_v57 = vadd.f32 %v422_v29, %v402_v54  ;;  %v318_v60 = vmul.f32 %v664_v46, %v317_v55  ;;  %v425_v8 = vadd.f32 %v422_v29, %v411_v43 }
 0x180   :  { %v426_v24 = vadd.f32 %v422_v29, %v420_v22 }
 0x181   :  { %v618_v62 = vmul.f32 -1.442695, %v423_v56  ;;  %v619_v3 = vmul.f32 -1.442695, %v424_v57  ;;  %v319_v5 = vadd.f32 %v664_v46, %v318_v60  ;;  %v620_v23 = vmul.f32 -1.442695, %v425_v8 }
 0x182   :  { %v621_v30 = vmul.f32 -1.442695, %v426_v24 }
 0x183   :  { %665 = vpow2.f32 %v618_v62  ;;  %v323_v17 = vsel %vm322_vm0, %v664_v46, %v319_v5 }
 0x184   :  { %667 = vpow2.f32 %v619_v3  ;;  %v328_v53 = vsel %vm325_vm1, %v327_v16, %v323_v17 }
 0x185   :  { %535 = vperm.xlu2 %629, %v328_v53   ;;  %669 = vpow2.f32 %v620_v23 }
 0x189   :  { %v666_v25 = vpop.eup %665 }
 0x18a   :  { %v668_v26 = vpop.eup %667  ;;  %v439_v27 = vadd.f32 1.0, %v666_v25 }
 0x18b   :  { %v440_v28 = vadd.f32 1.0, %v668_v26  ;;  %v670_v31 = vpop.eup %669 }
 0x18c   :  { %671 = vrcp.f32 %v439_v27  ;;  %v993_v37 = vadd.f32 1.0, %v670_v31  ;;  %v454_v63 = vand.u32 2147483648, %v439_v27  ;;  %v452_v40 = vand.u32 2147483647, %v439_v27 }
 0x18d   :  { %673 = vrcp.f32 %v440_v28  ;;  %v469_v42 = vand.u32 2147483648, %v440_v28  ;;  %v467_v44 = vand.u32 2147483647, %v440_v28  ;;  %vm448_vm4 = vweird.f32 %v439_v27 }
 0x18e   :  { %675 = vpow2.f32 %v621_v30  ;;  %v455_v48 = vor.u32 1.1754944e-38, %v454_v63  ;;  %vm463_vm6 = vweird.f32 %v440_v28  ;;  %vm453_vm7 = vcmp.eq.f32.partialorder %v452_v40, 8.507059e+37 }
 0x18f   :  { %677 = vrcp.f32 %v993_v37  ;;  %v470_v50 = vor.u32 1.1754944e-38, %v469_v42  ;;  %vm468_vm9 = vcmp.eq.f32.partialorder %v467_v44, 8.507059e+37  ;;  %vm478_vm10 = vweird.f32 %v993_v37 }
 0x192   :  { %v672_v32 = vpop.eup %671 }
 0x193   :  { %v674_v33 = vpop.eup %673  ;;  %v444_v34 = vmul.f32 %v672_v32, %v439_v27  ;;  %vm449_vm2 = vweird.f32 %v672_v32  ;;  %v482_v27 = vand.u32 2147483647, %v993_v37 }
 0x194   :  { %v459_v35 = vmul.f32 %v674_v33, %v440_v28  ;;  %v676_v15 = vpop.eup %675  ;;  %vm464_vm3 = vweird.f32 %v674_v33  ;;  %vm450_vm5 = vmor %vm448_vm4, %vm449_vm2  ;;  %v484_v28 = vand.u32 2147483648, %v993_v37 }
 0x195   :  { %v445_v36 = vsub.f32 1.0, %v444_v34  ;;  %v995_v46 = vadd.f32 1.0, %v676_v15  ;;  %vm465_vm8 = vmor %vm463_vm6, %vm464_vm3  ;;  %v678_v58 = vpop.eup %677  ;;  %vm483_vm0 = vcmp.eq.f32.partialorder %v482_v27, 8.507059e+37 }
 0x196   :  { %v460_v38 = vsub.f32 1.0, %v459_v35  ;;  %v511_v45 = vpop.permute.xlu2 %510  ;;  %v474_v5 = vmul.f32 %v678_v58, %v993_v37  ;;  %vm479_vm11 = vweird.f32 %v678_v58  ;;  %v485_v34 = vor.u32 1.1754944e-38, %v484_v28 }
 0x197   :  { %v446_v39 = vmul.f32 %v672_v32, %v445_v36  ;;  %v545_v51 = vmul.f32 %v511_v45, %v803_v9  ;;  %v546_v55 = vmul.f32 %v511_v45, %v805_v10  ;;  %679 = vrcp.f32 %v995_v46  ;;  %vm1012_vm13 = vmor %vm478_vm10, %vm479_vm11 }
 0x198   :  { %v461_v41 = vmul.f32 %v674_v33, %v460_v38  ;;  %v475_v8 = vsub.f32 1.0, %v474_v5  ;;  %v497_v30 = vand.u32 2147483647, %v995_v46  ;;  %v499_v31 = vand.u32 2147483648, %v995_v46 }
 0x199   :  { %v447_v47 = vadd.f32 %v672_v32, %v446_v39  ;;  %vm493_vm14 = vweird.f32 %v995_v46 }
 0x19a   :  { %v462_v49 = vadd.f32 %v674_v33, %v461_v41  ;;  %v476_v22 = vmul.f32 %v678_v58, %v475_v8  ;;  %vm498_vm1 = vcmp.eq.f32.partialorder %v497_v30, 8.507059e+37  ;;  %v500_v35 = vor.u32 1.1754944e-38, %v499_v31 }
 0x19b   :  { %v451_v29 = vsel %vm450_vm5, %v672_v32, %v447_v47 }
 0x19c   :  { %v456_v52 = vsel %vm453_vm7, %v455_v48, %v451_v29  ;;  %v466_v54 = vsel %vm465_vm8, %v674_v33, %v462_v49  ;;  %v477_v25 = vadd.f32 %v678_v58, %v476_v22 }
 0x19d   :  { %v471_v43 = vsel %vm468_vm9, %v470_v50, %v466_v54  ;;  %v561_v56 = vmul.f32 %v545_v51, %v456_v52  ;;  %v680_v59 = vpop.eup %679 }
 0x19e   :  { %v562_v57 = vmul.f32 %v546_v55, %v471_v43  ;;  %v489_v10 = vmul.f32 %v680_v59, %v995_v46  ;;  %vm494_vm12 = vweird.f32 %v680_v59 }
 0x19f   :  { %577 = vst [vmem:[#allocation6 + $0x10] sm:$0xff] %v561_v56  ;;  %vm495_vm15 = vmor %vm493_vm14, %vm494_vm12 }
 0x1a0   :  { %578 = vst [vmem:[#allocation6 + $0x18] sm:$0xff] %v562_v57  ;;  %v490_v16 = vsub.f32 1.0, %v489_v10 }
 0x1a2   :  { %v521_v60 = vpop.permute.xlu2 %520  ;;  %v491_v17 = vmul.f32 %v680_v59, %v490_v16 }
 0x1a3   :  { %v549_v61 = vmul.f32 %v521_v60, %v821_v18  ;;  %v550_v62 = vmul.f32 %v521_v60, %v823_v19 }
 0x1a4   :  { %v492_v26 = vadd.f32 %v680_v59, %v491_v17 }
 0x1a5   :  { %v565_v9 = vmul.f32 %v549_v61, %v456_v52  ;;  %v566_v3 = vmul.f32 %v550_v62, %v471_v43 }
 0x1a6   :  { %v496_v32 = vsel %vm495_vm15, %v680_v59, %v492_v26 }
 0x1a7   :  { %581 = vst [vmem:[#allocation6 + $0x30] sm:$0xff] %v565_v9  ;;  %v501_v40 = vsel %vm498_vm1, %v500_v35, %v496_v32 }
 0x1a8   :  { %582 = vst [vmem:[#allocation6 + $0x38] sm:$0xff] %v566_v3 }
 0x1af   :  { %v506_v53 = vpop.permute.xlu1 %505 }
 0x1b0   :  { %v543_v23 = vmul.f32 %v506_v53, %v785_v0  ;;  %v544_v24 = vmul.f32 %v506_v53, %v787_v1  ;;  %v481_v1 = vsel %vm1012_vm13, %v678_v58, %v477_v25 }
 0x1b1   :  { %v486_v39 = vsel %vm483_vm0, %v485_v34, %v481_v1 }
 0x1b2   :  { %v559_v18 = vmul.f32 %v543_v23, %v456_v52  ;;  %v560_v19 = vmul.f32 %v544_v24, %v471_v43 }
 0x1b4   :  { %575 = vst [vmem:[#allocation6] sm:$0xff] %v559_v18 }
 0x1b5   :  { %576 = vst [vmem:[#allocation6 + $0x8] sm:$0xff] %v560_v19  ;;  %v531_v33 = vpop.permute.xlu0 %530 }
 0x1b6   :  { %v553_v15 = vmul.f32 %v531_v33, %v807_v11  ;;  %v554_v37 = vmul.f32 %v531_v33, %v809_v12 }
 0x1b7   :  { %v516_v36 = vpop.permute.xlu1 %515 }
 0x1b8   :  { %v547_v63 = vmul.f32 %v516_v36, %v797_v6  ;;  %v548_v38 = vmul.f32 %v516_v36, %v799_v7  ;;  %v569_v42 = vmul.f32 %v553_v15, %v486_v39  ;;  %v570_v41 = vmul.f32 %v554_v37, %v501_v40 }
 0x1ba   :  { %v563_v44 = vmul.f32 %v547_v63, %v456_v52  ;;  %v564_v45 = vmul.f32 %v548_v38, %v471_v43  ;;  %585 = vst [vmem:[#allocation6 + $0x50] sm:$0xff] %v569_v42 }
 0x1bb   :  { %586 = vst [vmem:[#allocation6 + $0x58] sm:$0xff] %v570_v41 }
 0x1bc   :  { %579 = vst [vmem:[#allocation6 + $0x20] sm:$0xff] %v563_v44 }
 0x1bd   :  { %580 = vst [vmem:[#allocation6 + $0x28] sm:$0xff] %v564_v45 }
 0x1bf   :  { %v526_v46 = vpop.permute.xlu1 %525 }
 0x1c0   :  { %v551_v47 = vmul.f32 %v526_v46, %v789_v2  ;;  %v552_v11 = vmul.f32 %v526_v46, %v793_v4 }
 0x1c2   :  { %v567_v12 = vmul.f32 %v551_v47, %v486_v39  ;;  %v568_v48 = vmul.f32 %v552_v11, %v501_v40 }
 0x1c4   :  { %583 = vst [vmem:[#allocation6 + $0x40] sm:$0xff] %v567_v12 }
 0x1c5   :  { %584 = vst [vmem:[#allocation6 + $0x48] sm:$0xff] %v568_v48 }
 0x1c7   :  { %v541_v6 = vpop.permute.xlu1 %540 }
 0x1c8   :  { %v557_v7 = vmul.f32 %v541_v6, %v825_v20  ;;  %v558_v49 = vmul.f32 %v541_v6, %v827_v21 }
 0x1ca   :  { %v573_v29 = vmul.f32 %v557_v7, %v486_v39  ;;  %v574_v50 = vmul.f32 %v558_v49, %v501_v40 }
 0x1cc   :  { %589 = vst [vmem:[#allocation6 + $0x70] sm:$0xff] %v573_v29 }
 0x1cd   :  { %590 = vst [vmem:[#allocation6 + $0x78] sm:$0xff] %v574_v50 }
 0x1df   :  { %v536_v51 = vpop.permute.xlu2 %535 }
 0x1e0   :  { %v555_v52 = vmul.f32 %v536_v51, %v811_v13  ;;  %v556_v2 = vmul.f32 %v536_v51, %v813_v14 }
 0x1e2   :  { %v571_v4 = vmul.f32 %v555_v52, %v486_v39  ;;  %v572_v54 = vmul.f32 %v556_v2, %v501_v40 }
 0x1e4   :  { %587 = vst [vmem:[#allocation6 + $0x60] sm:$0xff] %v571_v4 }
 0x1e5   :  { %588 = vst [vmem:[#allocation6 + $0x68] sm:$0xff] %v572_v54 }
 0x1e6   :  { %603 = dma.vmem_to_hbm [thread:$0]  %s596_s15, 2048, %s598_s18, [#allocation5], %s734_s29, %s734_s29, %s735_s30  }
 0x1e7   :  { %731 = dma.done.wait [#allocation5], 2048  }
 0x1e8   :  { %732 = vsyncadd [#allocation5], 4294965248 }
 0x1e9   :  { %608 = vsyncpa [#allocation4], 1 }
 0x1ea   :  { %609 = vsyncpa [#allocation5], 1 }

</bundles_post_ra>
